<compile_context>
chip_gen: v6e
topology: v6e:2x2x1
jax: 0.10.0
libtpu: 0.0.40
codegen_flags: <defaults>
</compile_context>

<pallas_src>
import jax
import jax.numpy as jnp
from jax.experimental import pallas as pl
from jax.experimental.pallas import tpu as pltpu


def _cnn1d_block_kernel(x_ref, ml_ref, mr_ref, w1_ref, b1_ref, w2_ref, b2_ref,
                        o_ref):
    """One lane-dense block: conv1+bn1 -> relu -> conv2+bn2 -> +x -> relu.

    x_ref : (C, N) f32     activations, N = Bt*L lanes (Bt whole batch elems)
    ml/mr : (1, N) f32     0/1 masks: lane has a valid left / right neighbour
                           inside its own length-L segment
    w1/w2 : (C, 3*C) bf16  BN-scale-folded conv weights, columns = (tap, c_in)
    b1/b2 : (C, 1) f32     BN shifts
    o_ref : (C, N) f32
    """
    N = x_ref.shape[1]
    x = x_ref[...]
    ml = ml_ref[...]
    mr = mr_ref[...]

    def im2col(a):
        # Build the (3*C, N) tap matrix [a[p-1]; a[p]; a[p+1]] in registers.
        # pltpu.roll wraps around the block; the wrapped lanes are exactly the
        # per-batch-segment boundary lanes, which the masks zero out.
        left = pltpu.roll(a, 1, 1) * ml           # tap k=0 : a[p-1]
        right = pltpu.roll(a, N - 1, 1) * mr      # tap k=2 : a[p+1]
        return jnp.concatenate([left, a, right], axis=0).astype(jnp.bfloat16)

    # conv1 (BN1 scale pre-folded) -> bias -> relu    (dropout = identity, eval)
    y = jnp.dot(w1_ref[...], im2col(x), preferred_element_type=jnp.float32)
    h = jnp.maximum(y + b1_ref[...], 0.0)

    # conv2 (BN2 scale pre-folded) -> bias -> residual add -> relu
    z = jnp.dot(w2_ref[...], im2col(h), preferred_element_type=jnp.float32)
    o_ref[...] = jnp.maximum(z + b2_ref[...] + x, 0.0).astype(o_ref.dtype)


def _fold_bn_into_conv(w, bn, eps):
    """Fold eval-mode BatchNorm1d into the conv weight (scale) + a bias.

    w: (C_out, C_in, K) f32.  Returns (w_folded bf16 (C_out, C_in, K),
    bias f32 (C_out,)).  bn(conv(x, w)) == conv(x, s*w) + b.
    """
    s = bn["gamma"] / jnp.sqrt(bn["var"] + eps)
    b = bn["beta"] - bn["mean"] * s
    wf = (w.astype(jnp.float32) * s[:, None, None]).astype(jnp.bfloat16)
    return wf, b.astype(jnp.float32)


def _pick_block_batch(B, L, C):
    """Batch elements per grid step.  Lane width Bt*L must be a multiple of
    128 (dense stores, full MXU width) unless one block covers everything."""
    target_lanes = 1024
    max_block_bytes = 2 * 1024 * 1024      # f32 activation block budget
    best = None
    for bt in range(1, B + 1):
        if B % bt:
            continue
        lanes = bt * L
        if lanes % 128:
            continue
        if best is not None and C * lanes * 4 > max_block_bytes:
            break
        best = bt
        if lanes >= target_lanes:
            break
    return best if best is not None else B


def cnn1d_block(x, w1, bn1, w2, bn2, eps=1e-5, block_batch=None):
    """x: (B, C, L) f32.  w1/w2: (C_out, C_in, K) torch-layout conv weights.
    bn1/bn2: dicts with gamma, beta, mean, var (each (C,))."""
    B, C, L = x.shape
    C_out, C_in, K = w1.shape
    if K != 3:
        raise NotImplementedError("kernel_size=3 only")
    if C_out != C or C_in != C or w2.shape != (C, C, K):
        # TODO(synk): down_scale=True path (stride-2 conv1 + 1x1 downscale).
        raise NotImplementedError("down_scale=False path requires in_ch == out_ch")

    # Fold BN scale into weights (bf16 MXU operands), keep shifts in f32.
    w1f, b1 = _fold_bn_into_conv(w1, bn1, eps)
    w2f, b2 = _fold_bn_into_conv(w2, bn2, eps)
    # (C_out, C_in, K) -> (C_out, K*C_in): column index = k*C_in + ci, matching
    # the im2col row stacking [tap k=0 ; k=1 ; k=2] along the channel axis.
    w1m = jnp.transpose(w1f, (0, 2, 1)).reshape(C, K * C)
    w2m = jnp.transpose(w2f, (0, 2, 1)).reshape(C, K * C)
    b1c = b1.reshape(C, 1)
    b2c = b2.reshape(C, 1)

    # Lane-dense activation layout: (B, C, L) -> (C, B*L).
    xf = jnp.transpose(x.astype(jnp.float32), (1, 0, 2)).reshape(C, B * L)

    # Boundary masks (0 at per-segment edges where the shifted tap is padding).
    pos = jnp.arange(B * L, dtype=jnp.int32) % L
    mask_l = (pos != 0).astype(jnp.float32)[None, :]        # valid left neighbour
    mask_r = (pos != (L - 1)).astype(jnp.float32)[None, :]  # valid right neighbour

    if block_batch is None:
        bt = _pick_block_batch(B, L, C)
    else:
        bt = block_batch
        if B % bt or (bt != B and (bt * L) % 128):
            raise ValueError("block_batch must divide B and give lanes % 128 == 0")
    nb = B // bt
    N = bt * L

    grid_spec = pltpu.PrefetchScalarGridSpec(
        num_scalar_prefetch=0,
        grid=(nb,),
        in_specs=[
            pl.BlockSpec((C, N), lambda i: (0, i)),          # x (lane-dense)
            pl.BlockSpec((1, N), lambda i: (0, i)),          # left-valid mask
            pl.BlockSpec((1, N), lambda i: (0, i)),          # right-valid mask
            pl.BlockSpec((C, K * C), lambda i: (0, 0)),      # w1 (bn1-folded, bf16)
            pl.BlockSpec((C, 1), lambda i: (0, 0)),          # bn1 shift
            pl.BlockSpec((C, K * C), lambda i: (0, 0)),      # w2 (bn2-folded, bf16)
            pl.BlockSpec((C, 1), lambda i: (0, 0)),          # bn2 shift
        ],
        out_specs=pl.BlockSpec((C, N), lambda i: (0, i)),
    )

    out_flat = pl.pallas_call(
        _cnn1d_block_kernel,
        out_shape=jax.ShapeDtypeStruct((C, B * L), jnp.float32),
        grid_spec=grid_spec,
        compiler_params=pltpu.CompilerParams(
            dimension_semantics=("parallel",)),
    )(xf, mask_l, mask_r, w1m, b1c, w2m, b2c)

    return jnp.transpose(out_flat.reshape(C, B, L), (1, 0, 2))


def _ref_forward_f32(x, w1, bn1, w2, bn2, eps=1e-5):
    """Pure-JAX full-precision reference (lax conv)."""
    def fold(bn):
        s = bn["gamma"] / jnp.sqrt(bn["var"] + eps)
        b = bn["beta"] - bn["mean"] * s
        return s[None, :, None], b[None, :, None]

    s1, b1 = fold(bn1)
    s2, b2 = fold(bn2)
    dn = ("NCH", "OIH", "NCH")
    y = jax.lax.conv_general_dilated(x, w1, (1,), ((1, 1),), dimension_numbers=dn)
    h = jnp.maximum(y * s1 + b1, 0.0)
    z = jax.lax.conv_general_dilated(h, w2, (1,), ((1, 1),), dimension_numbers=dn)
    return jnp.maximum(z * s2 + b2 + x, 0.0)


def _ref_forward_bf16(x, w1, bn1, w2, bn2, eps=1e-5):
    """Reference mirroring the kernel's bf16 MXU operands / f32 accumulation."""
    w1f, b1 = _fold_bn_into_conv(w1, bn1, eps)
    w2f, b2 = _fold_bn_into_conv(w2, bn2, eps)
    dn = ("NCH", "OIH", "NCH")
    y = jax.lax.conv_general_dilated(
        x.astype(jnp.bfloat16), w1f, (1,), ((1, 1),), dimension_numbers=dn,
        preferred_element_type=jnp.float32)
    h = jnp.maximum(y + b1[None, :, None], 0.0)
    z = jax.lax.conv_general_dilated(
        h.astype(jnp.bfloat16), w2f, (1,), ((1, 1),), dimension_numbers=dn,
        preferred_element_type=jnp.float32)
    return jnp.maximum(z + b2[None, :, None] + x, 0.0)


if __name__ == "__main__":
    B, C, L, K = 16, 8, 16, 3      # in_ch == out_ch (down_scale=False config)

    key = jax.random.PRNGKey(0)
    ks = jax.random.split(key, 8)
    x = jax.random.normal(ks[0], (B, C, L), jnp.float32)
    w1 = jax.random.normal(ks[1], (C, C, K), jnp.float32) * 0.2
    w2 = jax.random.normal(ks[2], (C, C, K), jnp.float32) * 0.2
    bn1 = {
        "gamma": 1.0 + 0.1 * jax.random.normal(ks[3], (C,), jnp.float32),
        "beta": 0.1 * jax.random.normal(ks[4], (C,), jnp.float32),
        "mean": 0.05 * jax.random.normal(ks[5], (C,), jnp.float32),
        "var": jnp.ones((C,), jnp.float32) * 1.2,
    }
    bn2 = {
        "gamma": 1.0 + 0.1 * jax.random.normal(ks[6], (C,), jnp.float32),
        "beta": 0.1 * jax.random.normal(ks[7], (C,), jnp.float32),
        "mean": jnp.zeros((C,), jnp.float32),
        "var": jnp.ones((C,), jnp.float32) * 0.9,
    }

    # Explicit 8-batch blocks -> 128-lane tiles, grid of 2 steps.
    out = jax.block_until_ready(cnn1d_block(x, w1, bn1, w2, bn2, block_batch=8))
    # Auto-picked block size (single 256-lane block here, grid of 1).
    out_auto = jax.block_until_ready(cnn1d_block(x, w1, bn1, w2, bn2))

    ref_bf16 = _ref_forward_bf16(x, w1, bn1, w2, bn2)
    ref_f32 = _ref_forward_f32(x, w1, bn1, w2, bn2)

    assert out.shape == (B, C, L)
    assert jnp.allclose(out, ref_bf16, atol=1e-2, rtol=1e-2), \
        "mismatch vs bf16-matched reference"
    assert jnp.allclose(out_auto, ref_bf16, atol=1e-2, rtol=1e-2), \
        "mismatch vs bf16-matched reference (auto block)"
    assert jnp.allclose(out, ref_f32, atol=1e-1, rtol=1e-1), \
        "mismatch vs full-precision reference"

    print("KERNEL_OK")
</pallas_src>

<mosaic_0001>
module attributes {stable_mosaic.version = 11 : i64} {
  func.func @_cnn1d_block_kernel(%arg0: i32, %arg1: memref<8x128xf32, #tpu.memory_space<vmem>>, %arg2: memref<1x128xf32, #tpu.memory_space<vmem>>, %arg3: memref<1x128xf32, #tpu.memory_space<vmem>>, %arg4: memref<8x24xbf16, #tpu.memory_space<vmem>>, %arg5: memref<8x1xf32, #tpu.memory_space<vmem>>, %arg6: memref<8x24xbf16, #tpu.memory_space<vmem>>, %arg7: memref<8x1xf32, #tpu.memory_space<vmem>>, %arg8: memref<8x128xf32, #tpu.memory_space<vmem>>) attributes {dimension_semantics = [#tpu.dimension_semantics<parallel>], iteration_bounds = array<i64: 2>, scalar_prefetch = 0 : i64, scratch_operands = 0 : i64, tpu.core_type = #tpu.core_type<tc>, window_params = [{transform_indices = @transform_0, window_bounds = array<i64: 8, 128>}, {transform_indices = @transform_1, window_bounds = array<i64: 1, 128>}, {transform_indices = @transform_2, window_bounds = array<i64: 1, 128>}, {pipeline_mode = #tpu.pipeline_mode<synchronous>, transform_indices = @transform_3, window_bounds = array<i64: 8, 24>}, {pipeline_mode = #tpu.pipeline_mode<synchronous>, transform_indices = @transform_4, window_bounds = array<i64: 8, 1>}, {pipeline_mode = #tpu.pipeline_mode<synchronous>, transform_indices = @transform_5, window_bounds = array<i64: 8, 24>}, {pipeline_mode = #tpu.pipeline_mode<synchronous>, transform_indices = @transform_6, window_bounds = array<i64: 8, 1>}, {transform_indices = @transform_7, window_bounds = array<i64: 8, 128>}]} {
    %c0 = arith.constant 0 : index
    %c0_0 = arith.constant 0 : index
    %0 = vector.load %arg1[%c0, %c0_0] : memref<8x128xf32, #tpu.memory_space<vmem>>, vector<8x128xf32>
    %c0_1 = arith.constant 0 : index
    %c0_2 = arith.constant 0 : index
    %1 = vector.load %arg2[%c0_1, %c0_2] : memref<1x128xf32, #tpu.memory_space<vmem>>, vector<1x128xf32>
    %c0_3 = arith.constant 0 : index
    %c0_4 = arith.constant 0 : index
    %2 = vector.load %arg3[%c0_3, %c0_4] : memref<1x128xf32, #tpu.memory_space<vmem>>, vector<1x128xf32>
    %c0_5 = arith.constant 0 : index
    %c0_6 = arith.constant 0 : index
    %3 = vector.load %arg4[%c0_5, %c0_6] : memref<8x24xbf16, #tpu.memory_space<vmem>>, vector<8x24xbf16>
    %c1_i32 = arith.constant 1 : i32
    %4 = tpu.dynamic_rotate %0 by %c1_i32 dim 1 : vector<8x128xf32>, i32 -> vector<8x128xf32>
    %5 = vector.broadcast %1 : vector<1x128xf32> to vector<8x128xf32>
    %6 = arith.mulf %4, %5 : vector<8x128xf32>
    %c127_i32 = arith.constant 127 : i32
    %7 = tpu.dynamic_rotate %0 by %c127_i32 dim 1 : vector<8x128xf32>, i32 -> vector<8x128xf32>
    %8 = vector.broadcast %2 : vector<1x128xf32> to vector<8x128xf32>
    %9 = arith.mulf %7, %8 : vector<8x128xf32>
    %10 = tpu.concatenate %6, %0, %9 in 0 : vector<8x128xf32>, vector<8x128xf32>, vector<8x128xf32> -> vector<24x128xf32>
    %11 = arith.truncf %10 : vector<24x128xf32> to vector<24x128xbf16>
    %cst = arith.constant dense<0.000000e+00> : vector<8x128xf32>
    %12 = tpu.matmul %3, %11, %cst {dimension_numbers = #tpu.dot_dimension_numbers<[1], [0], [0], [1], [0, 0, 1, 1], [], []>} : vector<8x24xbf16>, vector<24x128xbf16>, vector<8x128xf32> -> vector<8x128xf32>
    %c0_7 = arith.constant 0 : index
    %c0_8 = arith.constant 0 : index
    %13 = vector.load %arg5[%c0_7, %c0_8] : memref<8x1xf32, #tpu.memory_space<vmem>>, vector<8x1xf32>
    %14 = vector.broadcast %13 : vector<8x1xf32> to vector<8x128xf32>
    %15 = arith.addf %12, %14 : vector<8x128xf32>
    %cst_9 = arith.constant 0.000000e+00 : f32
    %16 = vector.broadcast %cst_9 : f32 to vector<8x128xf32>
    %17 = arith.maximumf %15, %16 : vector<8x128xf32>
    %c0_10 = arith.constant 0 : index
    %c0_11 = arith.constant 0 : index
    %18 = vector.load %arg6[%c0_10, %c0_11] : memref<8x24xbf16, #tpu.memory_space<vmem>>, vector<8x24xbf16>
    %c1_i32_12 = arith.constant 1 : i32
    %19 = tpu.dynamic_rotate %17 by %c1_i32_12 dim 1 : vector<8x128xf32>, i32 -> vector<8x128xf32>
    %20 = vector.broadcast %1 : vector<1x128xf32> to vector<8x128xf32>
    %21 = arith.mulf %19, %20 : vector<8x128xf32>
    %c127_i32_13 = arith.constant 127 : i32
    %22 = tpu.dynamic_rotate %17 by %c127_i32_13 dim 1 : vector<8x128xf32>, i32 -> vector<8x128xf32>
    %23 = vector.broadcast %2 : vector<1x128xf32> to vector<8x128xf32>
    %24 = arith.mulf %22, %23 : vector<8x128xf32>
    %25 = tpu.concatenate %21, %17, %24 in 0 : vector<8x128xf32>, vector<8x128xf32>, vector<8x128xf32> -> vector<24x128xf32>
    %26 = arith.truncf %25 : vector<24x128xf32> to vector<24x128xbf16>
    %cst_14 = arith.constant dense<0.000000e+00> : vector<8x128xf32>
    %27 = tpu.matmul %18, %26, %cst_14 {dimension_numbers = #tpu.dot_dimension_numbers<[1], [0], [0], [1], [0, 0, 1, 1], [], []>} : vector<8x24xbf16>, vector<24x128xbf16>, vector<8x128xf32> -> vector<8x128xf32>
    %c0_15 = arith.constant 0 : index
    %c0_16 = arith.constant 0 : index
    %28 = vector.load %arg7[%c0_15, %c0_16] : memref<8x1xf32, #tpu.memory_space<vmem>>, vector<8x1xf32>
    %29 = vector.broadcast %28 : vector<8x1xf32> to vector<8x128xf32>
    %30 = arith.addf %27, %29 : vector<8x128xf32>
    %31 = arith.addf %30, %0 : vector<8x128xf32>
    %cst_17 = arith.constant 0.000000e+00 : f32
    %32 = vector.broadcast %cst_17 : f32 to vector<8x128xf32>
    %33 = arith.maximumf %31, %32 : vector<8x128xf32>
    %c0_18 = arith.constant 0 : index
    %c0_19 = arith.constant 0 : index
    %34 = vector.load %arg8[%c0_18, %c0_19] : memref<8x128xf32, #tpu.memory_space<vmem>>, vector<8x128xf32>
    tpu.vector_store %arg8[%c0_18, %c0_19], %33 {strides = array<i32>} : memref<8x128xf32, #tpu.memory_space<vmem>>, vector<8x128xf32>,
    return
  }
  func.func @transform_0(%arg0: i32) -> (i32, i32) {
    %c0_i32 = arith.constant 0 : i32
    %c0_i32_0 = arith.constant 0 : i32
    return %c0_i32, %arg0 : i32, i32
  }
  func.func @transform_1(%arg0: i32) -> (i32, i32) {
    %c0_i32 = arith.constant 0 : i32
    %c0_i32_0 = arith.constant 0 : i32
    return %c0_i32, %arg0 : i32, i32
  }
  func.func @transform_2(%arg0: i32) -> (i32, i32) {
    %c0_i32 = arith.constant 0 : i32
    %c0_i32_0 = arith.constant 0 : i32
    return %c0_i32, %arg0 : i32, i32
  }
  func.func @transform_3(%arg0: i32) -> (i32, i32) {
    %c0_i32 = arith.constant 0 : i32
    %c0_i32_0 = arith.constant 0 : i32
    %c0_i32_1 = arith.constant 0 : i32
    return %c0_i32, %c0_i32_0 : i32, i32
  }
  func.func @transform_4(%arg0: i32) -> (i32, i32) {
    %c0_i32 = arith.constant 0 : i32
    %c0_i32_0 = arith.constant 0 : i32
    %c0_i32_1 = arith.constant 0 : i32
    return %c0_i32, %c0_i32_0 : i32, i32
  }
  func.func @transform_5(%arg0: i32) -> (i32, i32) {
    %c0_i32 = arith.constant 0 : i32
    %c0_i32_0 = arith.constant 0 : i32
    %c0_i32_1 = arith.constant 0 : i32
    return %c0_i32, %c0_i32_0 : i32, i32
  }
  func.func @transform_6(%arg0: i32) -> (i32, i32) {
    %c0_i32 = arith.constant 0 : i32
    %c0_i32_0 = arith.constant 0 : i32
    %c0_i32_1 = arith.constant 0 : i32
    return %c0_i32, %c0_i32_0 : i32, i32
  }
  func.func @transform_7(%arg0: i32) -> (i32, i32) {
    %c0_i32 = arith.constant 0 : i32
    %c0_i32_0 = arith.constant 0 : i32
    return %c0_i32, %arg0 : i32, i32
  }
}

</mosaic_0001>

<bundles_post_ra>
// kernel: tpu_custom_call.1
= control target key start
LH: loop header
LB: loop body
LE: loop exit
PB: predicated region body
PF: predicated region fallthrough
CT: control target
= control target key end

     0   :  { %s1091_s0 = inlined_call_operand.vmem [shape: f32[8,256], index: 0, kind: input, shape index: {}]   ;;  %s1092_s1 = inlined_call_operand.hbm [shape: f32[1,256], index: 1, kind: input, shape index: {}]   ;;  %s1093_s2 = inlined_call_operand.hbm [shape: f32[1,256], index: 2, kind: input, shape index: {}]   ;;  %s1094_s3 = inlined_call_operand.vmem [shape: bf16[8,24], index: 3, kind: input, shape index: {}]   ;;  %s1095_s4 = inlined_call_operand.vmem [shape: f32[8,1], index: 4, kind: input, shape index: {}]   ;;  %s1096_s5 = inlined_call_operand.vmem [shape: bf16[8,24], index: 5, kind: input, shape index: {}]   ;;  %s1097_s6 = inlined_call_operand.vmem [shape: f32[8,1], index: 6, kind: input, shape index: {}]   ;;  %s1098_s7 = inlined_call_operand.hbm [shape: f32[8,256], index: 7, kind: output, shape index: {}]  }
   0x1   :  { %1102 = sst [smem:[#allocation11_spill]] %s1092_s1 }
   0x2   :  { %12 = vsyncpa [#allocation3], 0 }
   0x3   :  { %14 = vsyncpa [#allocation3 + $0x1], 0 }
   0x4   :  { %15 = vsyncpa [#allocation6], 0 }
   0x5   :  { %17 = vsyncpa [#allocation6 + $0x1], 0 }
   0x6   :  { %18 = vsyncpa [#allocation4], 0 }
   0x7   :  { %20 = vsyncpa [#allocation4 + $0x1], 0  ;;  %s869_s24 = smov 0   ;;  %s871_s25 = smov 0  }
   0x8   :  { %s873_s26 = smov 0   ;;  %s875_s27 = smov 0  }
   0x9 LB: > { %s890_s28 = sadd.s32 4294967295, %s819_s27   ;;  %s599_s29 = sadd.s32 4294967294, %s819_s27   ;;  %s819_s27 = sphi %s875_s27, %s1121_s27   ;;  %s815_s26 = sphi %s873_s26, %s1120_s26   ;;  %s811_s25 = sphi %s871_s25, %s1119_s25   ;;  %s807_s24 = sphi %s869_s24, %s1118_s24  }
   0xa   : > { %s894_s30 = sadd.s32 1, %s819_s27   ;;  %s59_s8 = sadd.s32 1, %s815_s26 }
   0xb   : > { %s56_s9 = ssub.s32 %s819_s27, %s894_s30  ;;  %p66_p0 = scmp.ne.s32.totalorder %s815_s26, %s811_s25 }
   0xc   : > { %p57_p1 = scmp.eq.s32.totalorder %s56_s9, 0  ;;  %p67_p2 = scmp.eq.s32.totalorder %s819_s27, 0 }
   0xd   : > { %p72_p3 = scmp.ne.s32.totalorder %s811_s25, %s807_s24  ;;  %p73_p4 = scmp.eq.s32.totalorder %s890_s28, 0 }
   0xe   : > { %s906_s10 = scalar_select %p57_p1, %s815_s26, %s59_s8  }
   0xf   : > { %p908_p5 = por %p67_p2, %p66_p0  ;;  %p912_p6 = por %p73_p4, %p72_p3 }
  0x10   : > { %p206_p7 = scmp.eq.s32.totalorder %s890_s28, 1  ;;  %p212_p8 = scmp.eq.s32.totalorder %s599_s29, 1 }
  0x11   : > { %s1104_s12 = scalar_select %p912_p6, 1, 0 }
  0x12   : > { %p654_p10 = scmp.lt.s32.totalorder %s819_s27, 2  ;;  %p919_p11 = por %p206_p7, %p66_p0 }
  0x13   : > { %p923_p12 = por %p212_p8, %p72_p3  ;;  %s928_s15 = sand.u32 1, %s815_s26  }
  0x14   : > { %s1105_s13 = scalar_select %p919_p11, 1, 0 }
  0x15   : > { %s1106_s14 = scalar_select %p923_p12, 1, 0 }
  0x16   : > { %s1099_s16 = sshll.u32 %s819_s27, 4  ;;  %s1107_s1 = sld [smem:[#allocation11_spill]] }
  0x17   : > { %s254_s20 = scalar_lea.vmem [#allocation2], %s928_s15  ;;  %p943_p13 = pnand %p654_p10, %p908_p5 }
  0x18   : > { %s261_s21 = sshll.u32 %s254_s20, 4  ;;  %s252_s23 = scalar_lea.sflag [#allocation3], %s928_s15  ;;  %s939_s21 = int_to_ptr.vmem [resolvable:$true] %s261_s21 }
  0x19   : > { %p697_p3 = pneg %p943_p13 }
  0x1c   : > { %s936_s19 = scalar_lea.hbm %s1107_s1, %s1099_s16  ;;  %s700_s11 = scalar_lea.hbm %s1107_s1, 32 }
  0x1d   : > { %s695_s29 = scalar_lea.hbm %s936_s19, 16  ;;  %p701_p5 = scmp.lt.s32.totalorder %s936_s19, %s1107_s1 }
  0x1e   : > { %p696_p2 = scmp.ne.s32.totalorder %s936_s19, %s695_s29  ;;  %p702_p8 = scmp.lt.s32.totalorder %s700_s11, %s695_s29 }
  0x20   : > { %p698_p4 = pnand %p697_p3, %p696_p2  ;;  %p703_p10 = por %p702_p8, %p701_p5 }
  0x22   : > { %p699_p7 = pneg %p698_p4 }
  0x24   : > { %p704_p9 = pnand %p703_p10, %p699_p7 }
  0x26   : > { %707 = shalt.err (!%p704_p9)
}
  0x27   : > { %s708_s20 = scalar_lea.vmem %s939_s21, 16  ;;  %s821_s8 = smov [#allocation2]  }
  0x28   : > { %p709_p0 = scmp.ne.s32.totalorder %s939_s21, %s708_s20  ;;  %s713_s9 = sshll.u32 %s821_s8, 4  ;;  %s714_s9 = int_to_ptr.vmem [resolvable:$false] %s713_s9 }
  0x29   : > { %s715_s16 = scalar_lea.vmem %s714_s9, 32  ;;  %p716_p1 = scmp.lt.s32.totalorder %s939_s21, %s714_s9 }
  0x2a   : > { %p711_p2 = pnand %p709_p0, %p697_p3  ;;  %p717_p12 = scmp.lt.s32.totalorder %s715_s16, %s708_s20 }
  0x2c   : > { %p712_p4 = pneg %p711_p2  ;;  %p718_p11 = por %p717_p12, %p716_p1 }
  0x2e   : > { %p719_p5 = pnand %p718_p11, %p712_p4 }
  0x30   : > { %722 = shalt.err (!%p719_p5)
}
  0x31   : > { %646 = dma.hbm_to_vmem [thread:$0]  (!%p943_p13), %s936_s19, 16, %s939_s21, %s252_s23  }
  0x32   : > { %p1109_p9 = scmp.lt.s32.totalorder %s819_s27, 3  ;;  %p1110_p0 = scmp.ge.s32.totalorder %s819_s27, 1 }
  0x33   : > { %s1112_s16 = sshll.u32 %s819_s27, 4  ;;  %s271_s20 = scalar_lea.vmem [#allocation5], %s928_s15 }
  0x34   : > { %p978_p7 = pnand %p1110_p0, %p1109_p9  ;;  %s987_s18 = scalar_lea.hbm %s1093_s2, %s1112_s16 }
  0x35   : > { %s278_s8 = sshll.u32 %s271_s20, 4  ;;  %s269_s9 = scalar_lea.sflag [#allocation6], %s928_s15  ;;  %s279_s8 = int_to_ptr.vmem [resolvable:$true] %s278_s8 }
  0x36   : > { %s1111_s29 = scalar_select %p978_p7, 1, 0 }
  0x37   : > { %s723_s19 = scalar_lea.hbm %s987_s18, 16  ;;  %s728_s1 = scalar_lea.hbm %s1093_s2, 32 }
  0x38   : > { %p724_p11 = scmp.ne.s32.totalorder %s987_s18, %s723_s19  ;;  %p729_p8 = scmp.lt.s32.totalorder %s987_s18, %s1093_s2 }
  0x39   : > { %p730_p10 = scmp.lt.s32.totalorder %s728_s1, %s723_s19 }
  0x3a   : > { %p726_p12 = pnand %p724_p11, %p697_p3 }
  0x3b   : > { %p731_p2 = por %p730_p10, %p729_p8 }
  0x3c   : > { %p727_p1 = pneg %p726_p12 }
  0x3e   : > { %p732_p4 = pnand %p731_p2, %p727_p1 }
  0x40   : > { %735 = shalt.err (!%p732_p4)
}
  0x41   : > { %s736_s17 = scalar_lea.vmem %s279_s8, 16  ;;  %s822_s15 = smov [#allocation5]  }
  0x42   : > { %p737_p5 = scmp.ne.s32.totalorder %s279_s8, %s736_s17  ;;  %s741_s20 = sshll.u32 %s822_s15, 4  ;;  %s742_s20 = int_to_ptr.vmem [resolvable:$false] %s741_s20 }
  0x43   : > { %s743_s21 = scalar_lea.vmem %s742_s20, 32  ;;  %p744_p11 = scmp.lt.s32.totalorder %s279_s8, %s742_s20 }
  0x44   : > { %p739_p9 = pnand %p737_p5, %p697_p3  ;;  %p745_p12 = scmp.lt.s32.totalorder %s743_s21, %s736_s17 }
  0x46   : > { %p740_p0 = pneg %p739_p9  ;;  %p746_p6 = por %p745_p12, %p744_p11 }
  0x48   : > { %p747_p7 = pnand %p746_p6, %p740_p0 }
  0x4a   : > { %750 = shalt.err (!%p747_p7)
}
  0x4b   : > { %649 = dma.hbm_to_vmem [thread:$0]  (!%p943_p13), %s987_s18, 16, %s279_s8, %s269_s9  }
  0x4c   : > { %p1113_p1 = scmp.ne.s32.totalorder %s1111_s29, 0 }
  0x4d   : > { %s1012_s1 = sand.u32 (!%p1113_p1), 1, %s811_s25   ;;  %p1114_p3 = scmp.ne.s32.totalorder (!%p1113_p1), %s1104_s12, 0 }
  0x4e   : > { %287 = sbr.rel (%p1113_p1) target bundleno = 756 (0x2f4), region = 48  ;;  %s290_s19 = scalar_lea.sflag (!%p1113_p1), [#allocation3], %s1012_s1 }
  0x4f   : > { %s292_s23 = scalar_lea.vmem (!%p1113_p1), [#allocation2], %s1012_s1 }
  0x53   : > { %794 = dma.done.wait (%p1114_p3), %s290_s19, 16  }
  0x54   : > { %796 = vsyncadd (%p1114_p3), %s290_s19, 4294967280  ;;  %s298_s22 = scalar_lea.sflag [#allocation6], %s1012_s1  ;;  %s300_s18 = scalar_lea.vmem [#allocation5], %s1012_s1 }
  0x55   : > { %798 = dma.done.wait (%p1114_p3), %s298_s22, 16  }
  0x56   : > { %800 = vsyncadd (%p1114_p3), %s298_s22, 4294967280  ;;  %p338_p6 = scmp.lt.s32.totalorder %s890_s28, 1  ;;  %v823_v0 = vmov 0.0   ;;  %vm824_vm0 = vmmov 0   ;;  %s825_s17 = smov 127   ;;  %v826_v2 = vmov 0  }
  0x57   : > { %621 = vmatprep.subr.bf16.mxu0 %v823_v0  ;;  %629 = vmatprep.subr.bf16.mxu1 %v823_v0  ;;  %v367_v3 = vld [vmem:[%s1095_s4] sm:$0xff]  ;;  %s827_s20 = smov 1   ;;  %vm377_vm1 = vcmask 1043456   ;;  %vm373_vm2 = vcmask 195584   ;;  %s612_s9 = sshll.u32 %s890_s28, 7 }
  0x58   : > { %s339_s29 = scalar_select %p338_p6, %s890_s28, 1  ;;  %625 = vmatprep.mubr.msk.bf16.mxu0 %vm824_vm0, %v823_v0  ;;  %633 = vmatprep.mubr.msk.bf16.mxu1 %vm824_vm0, %v823_v0  ;;  %v608_v4 = vld [vmem:[%s300_s18] ss:$0 sm:$0xff] }
  0x59   : > { %693 = vset.pattern.permute.xlu1 %v826_v2  ;;  %694 = vset.pattern.permute.xlu0 %v826_v2  ;;  %v607_v7 = vld [vmem:[%s292_s23] ss:$0 sm:$0xff]  ;;  %s1054_s15 = scalar_lea.hbm %s1098_s7, %s612_s9  ;;  %p1115_p7 = scmp.ne.s32.totalorder %s1105_s13, 0 }
  0x5a   : > { %s606_s8 = sshll.u32 %s339_s29, 3  ;;  %370 = vperm.xlu1 %693, %v367_v3   ;;  %v346_v13 = vld [vmem:[%s1094_s3] sm:$0xf]  ;;  %s828_s28 = smov [#allocation7]  }
  0x5b   : > { %s341_s16 = scalar_lea.vmem %s1091_s0, %s606_s8  ;;  %v431_v21 = vld [vmem:[%s1097_s6] sm:$0xff]  ;;  %s605_s8 = sshll.u32 %s1012_s1, 3 }
  0x5c   : > { %v343_v1 = vld [vmem:[%s341_s16] sm:$0xff]  ;;  %s337_s11 = scalar_lea.vmem [#allocation7], %s605_s8  ;;  %s755_s19 = sshll.u32 %s828_s28, 4  ;;  %s756_s19 = int_to_ptr.vmem [resolvable:$false] %s755_s19 }
  0x5d   : > { %356 = vrot.lane.b32.xlu0 %v343_v1, %s825_s17  ;;  %v422_v29 = vld [vmem:[%s1096_s5] sm:$0xf]  ;;  %s500_s16 = sshll.u32 %s337_s11, 4  ;;  %s757_s23 = scalar_lea.vmem %s756_s19, 256  ;;  %s501_s16 = int_to_ptr.vmem [resolvable:$true] %s500_s16 }
  0x5e   : > { %s751_s21 = scalar_lea.vmem %s501_s16, 128  ;;  %p758_p2 = scmp.lt.s32.totalorder %s501_s16, %s756_s19 }
  0x5f   : > { %p752_p13 = scmp.ne.s32.totalorder %s501_s16, %s751_s21  ;;  %p759_p4 = scmp.lt.s32.totalorder %s757_s23, %s751_s21 }
  0x61   : > { %347 = vrot.lane.b32.xlu0 %v343_v1, %s827_s20  ;;  %p753_p8 = pnand %p752_p13, %p1115_p7  ;;  %p760_p5 = por %p759_p4, %p758_p2 }
  0x63   : > { %p754_p10 = pneg %p753_p8 }
  0x65   : > { %p761_p9 = pnand %p760_p5, %p754_p10 }
  0xcf   : > { %v357_v5 = vpop.permute.xlu0 %356 }
  0xd0   : > { %v364_v6 = vmul.f32 %v608_v4, %v357_v5 }
  0xd2   : > { %v366_v8 = vpack.c.bf16 %v364_v6, %v364_v6 }
  0xd3   : > { %v348_v9 = vpop.permute.xlu0 %347 }
  0xd4   : > { %v355_v10 = vmul.f32 %v607_v7, %v348_v9  ;;  %v379_v11 = vsel %vm377_vm1, %v366_v8, 0 }
  0xd5   : > { %622 = vmatpush3.bf16.msra.mxu0 %v379_v11  ;;  %v371_v14 = vpop.permute.xlu1 %370 }
  0xd6   : > { %v365_v12 = vpack.c.bf16 %v343_v1, %v355_v10  ;;  %623 = vmatprep.subr.bf16.mxu0 %v823_v0 }
  0xd9   : > { %624 = vmatpush3.bf16.msra.mxu0 %v365_v12 }
  0xdc   : > { %626 = vmatmul.mubr.msk.bf16.vlgmr.msra.gmra.mxu0 %vm373_vm2, %v346_v13 }
 0x19c   : > { %v415_v15 = vpop.f32.mrf.mxu0 }
 0x19d   : > { %v416_v16 = vadd.f32 %v415_v15, %v371_v14 }
 0x19e   : > { %v627_v17 = vpop.f32.mrf.mxu0 }
 0x19f   : > { %v421_v18 = vmax.f32 %v416_v16, 0.0 }
 0x1a0   : > { %v418_v19 = vpop.f32.mrf.mxu0 }
 0x1a1   : > { %423 = vrot.lane.b32.xlu0 %v421_v18, %s827_s20  ;;  %426 = vrot.lane.b32.xlu1 %v421_v18, %s825_s17  ;;  %s487_s20 = scalar_lea.sflag [#allocation4], %s1012_s1 }
 0x1a2   : > { %v628_v20 = vpop.f32.mrf.mxu0 }
 0x1a5   : > { %434 = vperm.xlu1 %693, %v431_v21  }
 0x213   : > { %v427_v22 = vpop.permute.xlu1 %426  ;;  %v424_v23 = vpop.permute.xlu0 %423 }
 0x214   : > { %v428_v24 = vmul.f32 %v608_v4, %v427_v22  ;;  %v425_v26 = vmul.f32 %v607_v7, %v424_v23 }
 0x216   : > { %v430_v25 = vpack.c.bf16 %v428_v24, %v428_v24  ;;  %v429_v28 = vpack.c.bf16 %v421_v18, %v425_v26 }
 0x218   : > { %v441_v27 = vsel %vm377_vm1, %v430_v25, 0 }
 0x219   : > { %630 = vmatpush3.bf16.msra.mxu1 %v441_v27 }
 0x21a   : > { %631 = vmatprep.subr.bf16.mxu1 %v823_v0 }
 0x21d   : > { %632 = vmatpush3.bf16.msra.mxu1 %v429_v28 }
 0x220   : > { %634 = vmatmul.mubr.msk.bf16.vlgmr.msra.gmra.mxu1 %vm373_vm2, %v422_v29  ;;  %v435_v30 = vpop.permute.xlu1 %434 }
 0x2e0   : > { %v477_v31 = vpop.f32.mrf.mxu1 }
 0x2e1   : > { %v478_v32 = vadd.f32 %v477_v31, %v435_v30 }
 0x2e2   : > { %v635_v33 = vpop.f32.mrf.mxu1 }
 0x2e3   : > { %v483_v34 = vadd.f32 %v478_v32, %v343_v1 }
 0x2e4   : > { %v480_v35 = vpop.f32.mrf.mxu1 }
 0x2e5   : > { %v484_v36 = vmax.f32 %v483_v34, 0.0 }
 0x2e6   : > { %v636_v37 = vpop.f32.mrf.mxu1 }
 0x2e7   : > { %485 = vst [vmem:[%s337_s11] sm:$0xff] %v484_v36 }
 0x2e8   : > { %764 = shalt.err (!%p761_p9)
}
 0x2e9   : > { %s765_s22 = scalar_lea.hbm %s1054_s15, 128  ;;  %s769_s29 = scalar_lea.hbm %s1098_s7, 256 }
 0x2ea   : > { %p766_p0 = scmp.ne.s32.totalorder %s1054_s15, %s765_s22  ;;  %p770_p1 = scmp.lt.s32.totalorder %s1054_s15, %s1098_s7 }
 0x2eb   : > { %p771_p3 = scmp.lt.s32.totalorder %s769_s29, %s765_s22 }
 0x2ec   : > { %p767_p11 = pnand %p766_p0, %p1115_p7 }
 0x2ed   : > { %p772_p6 = por %p771_p3, %p770_p1 }
 0x2ee   : > { %p768_p12 = pneg %p767_p11 }
 0x2f0   : > { %p773_p13 = pnand %p772_p6, %p768_p12 }
 0x2f2   : > { %776 = shalt.err (!%p773_p13)
}
 0x2f3   : > { %641 = dma.vmem_to_hbm [thread:$0]  (%p1115_p7), %s501_s16, 128, %s1054_s15, %s487_s20  }
 0x2f4 PF: > { %s512_s11 = sand.u32 1, %s807_s24   ;;  %p1116_p8 = scmp.ne.s32.totalorder %s1106_s14, 0 }
 0x2f5   : > { %p1117_p10 = scmp.ge.s32.totalorder %s819_s27, 2  ;;  %s513_s17 = scalar_lea.sflag [#allocation4], %s512_s11 }
 0x2f7   : > { %p651_p2 = pnand %p1117_p10, %p1116_p8 }
 0x2f9   : > { %p652_p4 = pneg %p651_p2 }
 0x2fb   : > { %802 = dma.done.wait (%p652_p4), %s513_s17, 128  }
 0x2fc   : > { %804 = vsyncadd (%p652_p4), %s513_s17, 4294967168  ;;  %p23_p5 = scmp.ge.s32.totalorder %s894_s30, 4   ;;  %s1118_s24 = smov %s811_s25 }
 0x2fd   : > { %s1119_s25 = smov %s815_s26  ;;  %s1120_s26 = smov %s906_s10 }
 0x2fe   : > { %s1121_s27 = smov %s894_s30  ;;  %25 = sbr.rel (!%p23_p5) target bundleno = 9 (0x9), region = 109 }
 0x303   :  { %518 = vsyncpa [#allocation3], 1 }
 0x304   :  { %520 = vsyncpa [#allocation3 + $0x1], 1 }
 0x305   :  { %521 = vsyncpa [#allocation6], 1 }
 0x306   :  { %523 = vsyncpa [#allocation6 + $0x1], 1 }
 0x307   :  { %524 = vsyncpa [#allocation4], 1 }
 0x308   :  { %526 = vsyncpa [#allocation4 + $0x1], 1 }

</bundles_post_ra>
